<compile_context>
chip_gen: v7x
topology: tpu7x:2x2x1
jax: 0.10.0
libtpu: 0.0.40
codegen_flags: <defaults>
</compile_context>

<pallas_src>
import functools

import jax
import jax.numpy as jnp
from jax import lax
from jax.experimental import pallas as pl
from jax.experimental.pallas import tpu as pltpu

LANE = 128  # lane-dense padded width for the (B, 2) output


# ----------------------------- Pallas kernel ---------------------------------

def motif_simplecnn_kernel(x_ref, w1_ref, b1_ref, wl_ref, bl_ref, out_ref):
    """Fused conv(k=L) + ReLU + linear head on one VMEM-resident batch tile.

    x_ref  : (TB, L*C)   bf16  flattened input windows (im2col, one window per row)
    w1_ref : (L*C, H)    bf16  conv weight, tap-major flattened to match x layout
    b1_ref : (1, H)      f32   conv bias
    wl_ref : (H, LANE)   bf16  linear weight, zero-padded to 128 lanes
    bl_ref : (1, LANE)   f32   linear bias, zero-padded
    out_ref: (TB, LANE)  f32   padded output; columns [:2] are valid
    """
    # conv1 (kernel_size == L -> output length 1) as a single K=L*C MXU matmul
    h = jnp.dot(x_ref[...], w1_ref[...], preferred_element_type=jnp.float32)
    h = jnp.maximum(h + b1_ref[...], 0.0)                 # bias + ReLU in f32
    # linear head: single K=H matmul, lane-dense padded output store
    out = jnp.dot(h.astype(wl_ref.dtype), wl_ref[...],
                  preferred_element_type=jnp.float32)
    out_ref[...] = out + bl_ref[...]


# --------------------------- one-time weight prep ------------------------------

def prepare_params(params):
    """Hoisted out of the per-call path: fold PyTorch weights into MXU-friendly layouts."""
    W1, b1 = params["W1"], params["b1"]          # (H, C, K), (H,)
    Wl, bl = params["Wl"], params["bl"]          # (2, H),    (2,)
    H, C, K = W1.shape
    n_out = Wl.shape[0]
    # x is flattened as x[b, k*C + c]; match with w1_flat[k*C + c, h] = W1[h, c, k]
    w1_flat = jnp.transpose(W1, (2, 1, 0)).reshape(K * C, H)
    wl_pad = jnp.zeros((H, LANE), jnp.float32).at[:, :n_out].set(Wl.T)
    bl_pad = jnp.zeros((1, LANE), jnp.float32).at[0, :n_out].set(bl)
    return {
        "w1": w1_flat.astype(jnp.bfloat16),
        "b1": b1.reshape(1, H).astype(jnp.float32),
        "wl": wl_pad.astype(jnp.bfloat16),
        "bl": bl_pad.astype(jnp.float32),
    }


# ------------------------------- wrapper --------------------------------------

@functools.partial(jax.jit, static_argnames=("n_out", "block_b"))
def motif_simplecnn_forward(x, w1, b1, wl, bl, *, n_out=2, block_b=None):
    """x: (B, L, 4) float32 with L == conv kernel size (20)."""
    B, L, C = x.shape
    KC, H = w1.shape
    assert L * C == KC, "sequence length must equal the Conv1d kernel size (20)"

    # im2col: kernel covers the whole sequence -> one window per example
    x_flat = x.reshape(B, L * C).astype(jnp.bfloat16)

    tb = B if block_b is None else block_b
    assert B % tb == 0 and (tb == B or tb % 8 == 0)
    grid = (B // tb,)

    cost = pl.CostEstimate(
        flops=2 * B * (KC * H + H * LANE),
        transcendentals=0,
        bytes_accessed=(x_flat.size * 2 + w1.size * 2 + b1.size * 4
                        + wl.size * 2 + bl.size * 4 + B * LANE * 4),
    )

    out_pad = pl.pallas_call(
        motif_simplecnn_kernel,
        out_shape=jax.ShapeDtypeStruct((B, LANE), jnp.float32),
        grid=grid,
        in_specs=[
            pl.BlockSpec((tb, KC), lambda i: (i, 0)),     # batch tile of inputs
            pl.BlockSpec((KC, H), lambda i: (0, 0)),      # weights stay VMEM-resident
            pl.BlockSpec((1, H), lambda i: (0, 0)),
            pl.BlockSpec((H, LANE), lambda i: (0, 0)),
            pl.BlockSpec((1, LANE), lambda i: (0, 0)),
        ],
        out_specs=pl.BlockSpec((tb, LANE), lambda i: (i, 0)),
        compiler_params=pltpu.CompilerParams(
            dimension_semantics=("parallel",)),
        cost_estimate=cost,
    )(x_flat, w1, b1, wl, bl)

    return out_pad[:, :n_out]


# --------------------------- pure-JAX reference --------------------------------

def reference_forward(x, params):
    xt = jnp.transpose(x, (0, 2, 1))                       # (B, C, L)  NCL
    y = lax.conv_general_dilated(
        xt, params["W1"], window_strides=(1,), padding=[(0, 0)],
        dimension_numbers=("NCH", "OIH", "NCH"))
    y = y + params["b1"][None, :, None]
    y = jnp.squeeze(y, axis=-1)                            # (B, H)  (torch.squeeze)
    y = jnp.maximum(y, 0.0)
    return y @ params["Wl"].T + params["bl"]


# ---------------------------------- main ---------------------------------------

if __name__ == "__main__":
    B, L, C, H = 8, 20, 4, 500
    key = jax.random.PRNGKey(0)
    ks = jax.random.split(key, 5)

    params = {
        "W1": 0.2 * jax.random.normal(ks[0], (H, C, L), jnp.float32),
        "b1": 0.1 * jax.random.normal(ks[1], (H,), jnp.float32),
        "Wl": 0.2 * jax.random.normal(ks[2], (2, H), jnp.float32),
        "bl": 0.1 * jax.random.normal(ks[3], (2,), jnp.float32),
    }
    x = jax.random.normal(ks[4], (B, L, C), jnp.float32)

    prep = prepare_params(params)                          # one-time, outside the hot path
    out = motif_simplecnn_forward(x, prep["w1"], prep["b1"], prep["wl"], prep["bl"], n_out=2)
    out = jax.block_until_ready(out)

    ref = jax.block_until_ready(reference_forward(x, params))
    assert out.shape == (B, 2), out.shape
    max_err = jnp.max(jnp.abs(out - ref))
    # bf16 MXU inputs with f32 accumulation (K up to 500): loosened tolerance.
    assert jnp.allclose(out, ref, atol=1e-1, rtol=5e-2), f"max abs err {max_err}"

    print("KERNEL_OK")
</pallas_src>

<mosaic_0001>
module attributes {stable_mosaic.version = 11 : i64} {
  func.func @motif_simplecnn_kernel(%arg0: i32, %arg1: memref<8x80xbf16, #tpu.memory_space<vmem>>, %arg2: memref<80x500xbf16, #tpu.memory_space<vmem>>, %arg3: memref<1x500xf32, #tpu.memory_space<vmem>>, %arg4: memref<500x128xbf16, #tpu.memory_space<vmem>>, %arg5: memref<1x128xf32, #tpu.memory_space<vmem>>, %arg6: memref<8x128xf32, #tpu.memory_space<vmem>>) attributes {dimension_semantics = [#tpu.dimension_semantics<parallel>], iteration_bounds = array<i64: 1>, scalar_prefetch = 0 : i64, scratch_operands = 0 : i64, tpu.core_type = #tpu.core_type<tc>, window_params = [{transform_indices = @transform_0, window_bounds = array<i64: 8, 80>}, {pipeline_mode = #tpu.pipeline_mode<synchronous>, transform_indices = @transform_1, window_bounds = array<i64: 80, 500>}, {pipeline_mode = #tpu.pipeline_mode<synchronous>, transform_indices = @transform_2, window_bounds = array<i64: 1, 500>}, {pipeline_mode = #tpu.pipeline_mode<synchronous>, transform_indices = @transform_3, window_bounds = array<i64: 500, 128>}, {pipeline_mode = #tpu.pipeline_mode<synchronous>, transform_indices = @transform_4, window_bounds = array<i64: 1, 128>}, {transform_indices = @transform_5, window_bounds = array<i64: 8, 128>}]} {
    %c0 = arith.constant 0 : index
    %c0_0 = arith.constant 0 : index
    %0 = vector.load %arg1[%c0, %c0_0] : memref<8x80xbf16, #tpu.memory_space<vmem>>, vector<8x80xbf16>
    %c0_1 = arith.constant 0 : index
    %c0_2 = arith.constant 0 : index
    %1 = vector.load %arg2[%c0_1, %c0_2] : memref<80x500xbf16, #tpu.memory_space<vmem>>, vector<80x500xbf16>
    %cst = arith.constant dense<0.000000e+00> : vector<8x500xf32>
    %2 = tpu.matmul %0, %1, %cst {dimension_numbers = #tpu.dot_dimension_numbers<[1], [0], [0], [1], [0, 0, 1, 1], [], []>} : vector<8x80xbf16>, vector<80x500xbf16>, vector<8x500xf32> -> vector<8x500xf32>
    %c0_3 = arith.constant 0 : index
    %c0_4 = arith.constant 0 : index
    %3 = vector.load %arg3[%c0_3, %c0_4] : memref<1x500xf32, #tpu.memory_space<vmem>>, vector<1x500xf32>
    %4 = vector.broadcast %3 : vector<1x500xf32> to vector<8x500xf32>
    %5 = arith.addf %2, %4 : vector<8x500xf32>
    %cst_5 = arith.constant 0.000000e+00 : f32
    %6 = vector.broadcast %cst_5 : f32 to vector<8x500xf32>
    %7 = arith.maximumf %5, %6 : vector<8x500xf32>
    %8 = arith.truncf %7 : vector<8x500xf32> to vector<8x500xbf16>
    %c0_6 = arith.constant 0 : index
    %c0_7 = arith.constant 0 : index
    %9 = vector.load %arg4[%c0_6, %c0_7] : memref<500x128xbf16, #tpu.memory_space<vmem>>, vector<500x128xbf16>
    %cst_8 = arith.constant dense<0.000000e+00> : vector<8x128xf32>
    %10 = tpu.matmul %8, %9, %cst_8 {dimension_numbers = #tpu.dot_dimension_numbers<[1], [0], [0], [1], [0, 0, 1, 1], [], []>} : vector<8x500xbf16>, vector<500x128xbf16>, vector<8x128xf32> -> vector<8x128xf32>
    %c0_9 = arith.constant 0 : index
    %c0_10 = arith.constant 0 : index
    %11 = vector.load %arg5[%c0_9, %c0_10] : memref<1x128xf32, #tpu.memory_space<vmem>>, vector<1x128xf32>
    %12 = vector.broadcast %11 : vector<1x128xf32> to vector<8x128xf32>
    %13 = arith.addf %10, %12 : vector<8x128xf32>
    %c0_11 = arith.constant 0 : index
    %c0_12 = arith.constant 0 : index
    %14 = vector.load %arg6[%c0_11, %c0_12] : memref<8x128xf32, #tpu.memory_space<vmem>>, vector<8x128xf32>
    tpu.vector_store %arg6[%c0_11, %c0_12], %13 {strides = array<i32>} : memref<8x128xf32, #tpu.memory_space<vmem>>, vector<8x128xf32>,
    return
  }
  func.func @transform_0(%arg0: i32) -> (i32, i32) {
    %c0_i32 = arith.constant 0 : i32
    %c0_i32_0 = arith.constant 0 : i32
    return %arg0, %c0_i32 : i32, i32
  }
  func.func @transform_1(%arg0: i32) -> (i32, i32) {
    %c0_i32 = arith.constant 0 : i32
    %c0_i32_0 = arith.constant 0 : i32
    %c0_i32_1 = arith.constant 0 : i32
    return %c0_i32, %c0_i32_0 : i32, i32
  }
  func.func @transform_2(%arg0: i32) -> (i32, i32) {
    %c0_i32 = arith.constant 0 : i32
    %c0_i32_0 = arith.constant 0 : i32
    %c0_i32_1 = arith.constant 0 : i32
    return %c0_i32, %c0_i32_0 : i32, i32
  }
  func.func @transform_3(%arg0: i32) -> (i32, i32) {
    %c0_i32 = arith.constant 0 : i32
    %c0_i32_0 = arith.constant 0 : i32
    %c0_i32_1 = arith.constant 0 : i32
    return %c0_i32, %c0_i32_0 : i32, i32
  }
  func.func @transform_4(%arg0: i32) -> (i32, i32) {
    %c0_i32 = arith.constant 0 : i32
    %c0_i32_0 = arith.constant 0 : i32
    %c0_i32_1 = arith.constant 0 : i32
    return %c0_i32, %c0_i32_0 : i32, i32
  }
  func.func @transform_5(%arg0: i32) -> (i32, i32) {
    %c0_i32 = arith.constant 0 : i32
    %c0_i32_0 = arith.constant 0 : i32
    return %arg0, %c0_i32 : i32, i32
  }
}

</mosaic_0001>

<bundles_post_ra>
// kernel: motif_simplecnn_forward.1
= control target key start
LH: loop header
LB: loop body
LE: loop exit
PB: predicated region body
PF: predicated region fallthrough
CT: control target
= control target key end

     0   :  { %10 = vsyncpa [#allocation3], 0  ;;  %s931_s0 = inlined_call_operand.vmem [shape: bf16[8,80], index: 0, kind: input, shape index: {}]   ;;  %s932_s1 = inlined_call_operand.hbm [shape: bf16[80,500], index: 1, kind: input, shape index: {}]   ;;  %s933_s2 = inlined_call_operand.vmem [shape: f32[1,500], index: 2, kind: input, shape index: {}]   ;;  %s934_s3 = inlined_call_operand.hbm [shape: bf16[500,128], index: 3, kind: input, shape index: {}]   ;;  %s935_s4 = inlined_call_operand.vmem [shape: f32[1,128], index: 4, kind: input, shape index: {}]   ;;  %s936_s5 = inlined_call_operand.vmem [shape: f32[8,128], index: 5, kind: output, shape index: {}]  }
   0x1   :  { %11 = vsyncpa [#allocation5], 0  ;;  %s858_s18 = smov [#allocation2]   ;;  %s810_s22 = scalar_lea.hbm %s932_s1, 2560 }
   0x2   :  { %s19_s19 = sshll.u32 %s858_s18, 4  ;;  %p811_p0 = scmp.ne.s32.totalorder %s932_s1, %s810_s22  ;;  %s20_s19 = int_to_ptr.vmem [resolvable:$true] %s19_s19 }
   0x3   :  { %p814_p1 = scmp.lt.u32.totalorder %s810_s22, %s932_s1 }
   0x5   :  { %p816_p2 = pnand %p814_p1, %p811_p0 }
   0x7   :  { %819 = shalt.err (!%p816_p2)
}
   0x8   :  { %s820_s27 = scalar_lea.vmem %s20_s19, 2560  ;;  %p825_p4 = scmp.lt.s32.totalorder %s20_s19, %s20_s19 }
   0x9   :  { %p821_p3 = scmp.ne.s32.totalorder %s20_s19, %s820_s27  ;;  %p826_p5 = scmp.lt.s32.totalorder %s820_s27, %s820_s27 }
   0xb   :  { %p827_p6 = por %p826_p5, %p825_p4 }
   0xd   :  { %p828_p7 = pnand %p827_p6, %p821_p3 }
   0xf   :  { %831 = shalt.err (!%p828_p7)
}
  0x10   :  { %s859_s28 = smov 256   ;;  %s860_s29 = smov 16  }
  0x11   :  { %25 = dma.hbm_to_vmem [thread:$0]  %s932_s1, 2560, %s20_s19, [#allocation3], %s859_s28, %s859_s28, %s860_s29  }
  0x12   :  { %s861_s7 = smov [#allocation4]   ;;  %s832_s11 = scalar_lea.hbm %s934_s3, 4032 }
  0x13   :  { %s33_s8 = sshll.u32 %s861_s7, 4  ;;  %p833_p8 = scmp.ne.s32.totalorder %s934_s3, %s832_s11  ;;  %s34_s8 = int_to_ptr.vmem [resolvable:$true] %s33_s8 }
  0x14   :  { %p836_p9 = scmp.lt.u32.totalorder %s832_s11, %s934_s3 }
  0x16   :  { %p838_p10 = pnand %p836_p9, %p833_p8 }
  0x18   :  { %841 = shalt.err (!%p838_p10)
}
  0x19   :  { %s842_s16 = scalar_lea.vmem %s34_s8, 4032  ;;  %p847_p12 = scmp.lt.s32.totalorder %s34_s8, %s34_s8 }
  0x1a   :  { %p843_p11 = scmp.ne.s32.totalorder %s34_s8, %s842_s16  ;;  %p848_p13 = scmp.lt.s32.totalorder %s842_s16, %s842_s16 }
  0x1c   :  { %p849_p0 = por %p848_p13, %p847_p12 }
  0x1e   :  { %p850_p1 = pnand %p849_p0, %p843_p11 }
  0x20   :  { %853 = shalt.err (!%p850_p1)
}
  0x21   :  { %s862_s1 = smov 64   ;;  %s863_s17 = smov 4  }
  0x22   :  { %39 = dma.hbm_to_vmem [thread:$0]  %s934_s3, 4032, %s34_s8, [#allocation5], %s862_s1, %s862_s1, %s863_s17  }
  0x23   :  { %854 = dma.done.wait [#allocation3], 2560  }
  0x24   :  { %855 = vsyncadd [#allocation3], 4294964736 }
  0x25   :  { %856 = dma.done.wait [#allocation5], 4032  }
  0x26   :  { %857 = vsyncadd [#allocation5], 4294963264  ;;  %v864_v0 = vmov 0   ;;  %v748_v1 = vld [vmem:[#allocation2 + $0x4] ss:$16 sps:$4 sm:$0xff]   ;;  %vm192_vm0 = vcmask 654336   ;;  %v72_v54 = vlaneseq }
  0x27   :  { %228 = vmatprep.mubr.bf16.mxu0 %v864_v0  ;;  %269 = vmatprep.mubr.bf16.mxu1 %v864_v0  ;;  %v750_v2 = vld [vmem:[#allocation2 + $0xc] ss:$16 sps:$4 sm:$0xff]   ;;  %v752_v3 = vld [vmem:[#allocation2] ss:$16 sps:$4 sm:$0xff]   ;;  %v753_v4 = vld [vmem:[#allocation2 + $0x8] ss:$16 sps:$4 sm:$0xff]  }
  0x28   :  { %196 = vmatprep.subr.bf16.mxu0 %v748_v1  ;;  %237 = vmatprep.subr.bf16.mxu1 %v750_v2  ;;  %v754_v5 = vld [vmem:[#allocation2 + $0x24] ss:$16 sps:$4 sm:$0xff]   ;;  %v756_v6 = vld [vmem:[#allocation2 + $0x2c] ss:$16 sps:$4 sm:$0xff]   ;;  %v758_v7 = vld [vmem:[#allocation2 + $0x20] ss:$16 sps:$4 sm:$0xff]  }
  0x29   :  { %197 = vmatpush1.bf16.msra.mxu0 %v752_v3  ;;  %238 = vmatpush1.bf16.msra.mxu1 %v753_v4  ;;  %v759_v8 = vld [vmem:[#allocation2 + $0x28] ss:$16 sps:$4 sm:$0xff]   ;;  %v760_v9 = vld [vmem:[#allocation2 + $0x44] ss:$16 sps:$4 sm:$0xff]   ;;  %v762_v10 = vld [vmem:[#allocation2 + $0x4c] ss:$16 sps:$4 sm:$0xff]  }
  0x2a   :  { %198 = vmatprep.subr.bf16.mxu0 %v754_v5  ;;  %239 = vmatprep.subr.bf16.mxu1 %v756_v6  ;;  %v764_v11 = vld [vmem:[#allocation2 + $0x40] ss:$16 sps:$4 sm:$0xff]   ;;  %v765_v12 = vld [vmem:[#allocation2 + $0x48] ss:$16 sps:$4 sm:$0xff]   ;;  %v766_v13 = vld [vmem:[#allocation2 + $0x64] ss:$16 sps:$4 sm:$0xff]  }
  0x2b   :  { %v768_v14 = vld [vmem:[#allocation2 + $0x6c] ss:$16 sps:$4 sm:$0xff]   ;;  %v770_v15 = vld [vmem:[#allocation2 + $0x60] ss:$16 sps:$4 sm:$0xff]   ;;  %v771_v16 = vld [vmem:[#allocation2 + $0x68] ss:$16 sps:$4 sm:$0xff]  }
  0x2c   :  { %v772_v17 = vld [vmem:[#allocation2 + $0x84] ss:$16 sps:$4 sm:$0xff]   ;;  %v774_v18 = vld [vmem:[#allocation2 + $0x8c] ss:$16 sps:$4 sm:$0xff]   ;;  %v776_v19 = vld [vmem:[#allocation2 + $0x80] ss:$16 sps:$4 sm:$0xff]  }
  0x2d   :  { %199 = vmatpush1.bf16.msra.mxu0 %v758_v7  ;;  %240 = vmatpush1.bf16.msra.mxu1 %v759_v8  ;;  %v777_v20 = vld [vmem:[#allocation2 + $0x88] ss:$16 sps:$4 sm:$0xff]   ;;  %v778_v21 = vld [vmem:[#allocation4 + $0x40] sm:$0xff]   ;;  %v786_v30 = vld [vmem:[#allocation4 + $0x50] sm:$0xff]   ;;  %vm549_vm1 = vcmask 1041408   ;;  %v73_v55 = vshrl.u32 %v72_v54, 7 }
  0x2e   :  { %200 = vmatprep.subr.bf16.mxu0 %v760_v9  ;;  %241 = vmatprep.subr.bf16.mxu1 %v762_v10  ;;  %v779_v22 = vld [vmem:[#allocation4 + $0xc0] sm:$0xff]   ;;  %v782_v26 = vld [vmem:[#allocation4 + $0x48] sm:$0xff]   ;;  %v787_v31 = vld [vmem:[#allocation4 + $0xd0] sm:$0xff]   ;;  %vm545_vm2 = vcmask 949248  }
  0x2f   :  { %v49_v23 = vld [vmem:[%s931_s0] sm:$0xf]  ;;  %v783_v27 = vld [vmem:[#allocation4 + $0xc8] sm:$0xff]   ;;  %v788_v32 = vld [vmem:[#allocation4 + $0x10] sm:$0xff]   ;;  %v74_v56 = vsub.s32 0, %v73_v55  ;;  %v82_v57 = vsub.s32 2, %v73_v55 }
  0x30   :  { %v780_v24 = vld [vmem:[#allocation4] sm:$0xff]   ;;  %v784_v28 = vld [vmem:[#allocation4 + $0x8] sm:$0xff]   ;;  %v789_v33 = vld [vmem:[#allocation4 + $0x90] sm:$0xff]   ;;  %v78_v59 = vsub.s32 1, %v73_v55  ;;  %v86_v60 = vsub.s32 3, %v73_v55 }
  0x31   :  { %201 = vmatpush1.bf16.msra.mxu0 %v764_v11  ;;  %242 = vmatpush1.bf16.msra.mxu1 %v765_v12  ;;  %v781_v25 = vld [vmem:[#allocation4 + $0x80] sm:$0xff]   ;;  %v785_v29 = vld [vmem:[#allocation4 + $0x88] sm:$0xff]   ;;  %v790_v34 = vld [vmem:[#allocation4 + $0x58] sm:$0xff]  }
  0x32   :  { %202 = vmatprep.subr.bf16.mxu0 %v766_v13  ;;  %243 = vmatprep.subr.bf16.mxu1 %v768_v14  ;;  %v791_v35 = vld [vmem:[#allocation4 + $0xd8] sm:$0xff]   ;;  %v794_v38 = vld [vmem:[#allocation4 + $0x60] sm:$0xff]   ;;  %v798_v42 = vld [vmem:[#allocation4 + $0x68] sm:$0xff]  }
  0x33   :  { %v792_v36 = vld [vmem:[#allocation4 + $0x18] sm:$0xff]   ;;  %v795_v39 = vld [vmem:[#allocation4 + $0xe0] sm:$0xff]   ;;  %v799_v43 = vld [vmem:[#allocation4 + $0xe8] sm:$0xff]  }
  0x34   :  { %v793_v37 = vld [vmem:[#allocation4 + $0x98] sm:$0xff]   ;;  %v796_v40 = vld [vmem:[#allocation4 + $0x20] sm:$0xff]   ;;  %v800_v44 = vld [vmem:[#allocation4 + $0x28] sm:$0xff]  }
  0x35   :  { %203 = vmatpush1.bf16.msra.mxu0 %v770_v15  ;;  %244 = vmatpush1.bf16.msra.mxu1 %v771_v16  ;;  %v797_v41 = vld [vmem:[#allocation4 + $0xa0] sm:$0xff]   ;;  %v801_v45 = vld [vmem:[#allocation4 + $0xa8] sm:$0xff]   ;;  %v802_v46 = vld [vmem:[#allocation4 + $0x70] sm:$0xff]  }
  0x36   :  { %204 = vmatprep.subr.bf16.mxu0 %v772_v17  ;;  %245 = vmatprep.subr.bf16.mxu1 %v774_v18  ;;  %v803_v47 = vld [vmem:[#allocation4 + $0xf0] sm:$0xff]   ;;  %v806_v50 = vld [vmem:[#allocation4 + $0x78] sm:$0xff]   ;;  %v70_v58 = vld [vmem:[%s933_s2] sm:$0xf] }
  0x37   :  { %v804_v48 = vld [vmem:[#allocation4 + $0x30] sm:$0xff]   ;;  %v807_v51 = vld [vmem:[#allocation4 + $0xf8] ss:$0 sps:$4 sm:$0x33]   ;;  %v75_v61 = vrot.slane %v70_v58, %v74_v56  ;;  %v83_v62 = vrot.slane %v70_v58, %v82_v57  ;;  %v79_v63 = vrot.slane %v70_v58, %v78_v59  ;;  %v87_v0 = vrot.slane %v70_v58, %v86_v60 }
  0x38   :  { %v805_v49 = vld [vmem:[#allocation4 + $0xb0] sm:$0xff]   ;;  %v808_v52 = vld [vmem:[#allocation4 + $0x38] sm:$0xff]  }
  0x39   :  { %205 = vmatpush1.bf16.msra.mxu0 %v776_v19  ;;  %246 = vmatpush1.bf16.msra.mxu1 %v777_v20  ;;  %v809_v53 = vld [vmem:[#allocation4 + $0xb8] sm:$0xff]  }
  0x3a   :  { %696 = vmatprep.subr.bf16.mxu0 %v778_v21  ;;  %718 = vmatprep.subr.bf16.mxu1 %v779_v22 }
  0x3c   :  { %660 = vmatmul.mubr.msk.bf16.vlgmr.msra.gmra.mrb[0].mxu0 %vm192_vm0, %v49_v23  ;;  %661 = vmatmul.mubr.msk.bf16.vlgmr.msra.gmra.mrb[0].mxu1 %vm192_vm0, %v49_v23  ;;  %v662_v23 = vld [vmem:[%s935_s4] ss:$0 sm:$0xff] }
  0x3d   :  { %697 = vmatpush3.bf16.msra.mxu0 %v780_v24  ;;  %719 = vmatpush3.bf16.msra.mxu1 %v781_v25 }
  0x3e   :  { %698 = vmatprep.subr.bf16.mxu0 %v782_v26  ;;  %720 = vmatprep.subr.bf16.mxu1 %v783_v27 }
  0x41   :  { %699 = vmatpush3.bf16.msra.mxu0 %v784_v28  ;;  %721 = vmatpush3.bf16.msra.mxu1 %v785_v29 }
  0x42   :  { %700 = vmatprep.subr.bf16.mxu0 %v786_v30  ;;  %722 = vmatprep.subr.bf16.mxu1 %v787_v31 }
  0x45   :  { %701 = vmatpush3.bf16.msra.mxu0 %v788_v32  ;;  %723 = vmatpush3.bf16.msra.mxu1 %v789_v33 }
  0x46   :  { %702 = vmatprep.subr.bf16.mxu0 %v790_v34  ;;  %724 = vmatprep.subr.bf16.mxu1 %v791_v35 }
  0x49   :  { %703 = vmatpush3.bf16.msra.mxu0 %v792_v36  ;;  %725 = vmatpush3.bf16.msra.mxu1 %v793_v37 }
  0x4a   :  { %704 = vmatprep.subr.bf16.mxu0 %v794_v38  ;;  %726 = vmatprep.subr.bf16.mxu1 %v795_v39 }
  0x4d   :  { %705 = vmatpush3.bf16.msra.mxu0 %v796_v40  ;;  %727 = vmatpush3.bf16.msra.mxu1 %v797_v41 }
  0x4e   :  { %706 = vmatprep.subr.bf16.mxu0 %v798_v42  ;;  %728 = vmatprep.subr.bf16.mxu1 %v799_v43 }
  0x51   :  { %707 = vmatpush3.bf16.msra.mxu0 %v800_v44  ;;  %729 = vmatpush3.bf16.msra.mxu1 %v801_v45 }
  0x52   :  { %708 = vmatprep.subr.bf16.mxu0 %v802_v46  ;;  %730 = vmatprep.subr.bf16.mxu1 %v803_v47 }
  0x55   :  { %709 = vmatpush3.bf16.msra.mxu0 %v804_v48  ;;  %731 = vmatpush3.bf16.msra.mxu1 %v805_v49 }
  0x56   :  { %710 = vmatprep.subr.bf16.mxu0 %v806_v50  ;;  %740 = vmatprep.subr.msk.bf16.mxu1 %vm549_vm1, %v807_v51 }
  0x59   :  { %711 = vmatpush3.bf16.msra.mxu0 %v808_v52  ;;  %733 = vmatpush3.bf16.msra.mxu1 %v809_v53 }
 0x10f   :  { %v230_v1 = vpop.f32.mrb[0].mxu0  ;;  %v271_v2 = vpop.f32.mrb[0].mxu1 }
 0x110   :  { %v231_v3 = vadd.f32 %v230_v1, %v75_v61  ;;  %v272_v4 = vadd.f32 %v271_v2, %v83_v62  ;;  %v232_v5 = vpop.f32.mrb[1].mxu0  ;;  %v273_v6 = vpop.f32.mrb[1].mxu1 }
 0x111   :  { %v233_v7 = vadd.f32 %v232_v5, %v79_v63  ;;  %v274_v8 = vadd.f32 %v273_v6, %v87_v0  ;;  %v234_v9 = vpop.f32.mrb[2].mxu0  ;;  %v275_v10 = vpop.f32.mrb[2].mxu1 }
 0x112   :  { %v278_v11 = vmax.f32 %v231_v3, 0.0  ;;  %v280_v12 = vmax.f32 %v272_v4, 0.0  ;;  %v235_v13 = vpop.f32.mrb[3].mxu0  ;;  %v276_v14 = vpop.f32.mrb[3].mxu1 }
 0x113   :  { %v279_v15 = vmax.f32 %v233_v7, 0.0  ;;  %v281_v16 = vmax.f32 %v274_v8, 0.0 }
 0x114   :  { %v284_v17 = vpack.c.bf16 %v280_v12, %v280_v12  ;;  %v282_v20 = vpack.c.bf16 %v278_v11, %v278_v11 }
 0x115   :  { %v283_v18 = vpack.c.bf16 %v279_v15, %v279_v15  ;;  %v285_v19 = vpack.c.bf16 %v281_v16, %v281_v16 }
 0x117   :  { %585 = vmatprep.mubr.bf16.mxu0 %v283_v18  ;;  %695 = vmatprep.mubr.msk.bf16.mxu1 %vm545_vm2, %v285_v19 }
 0x118   :  { %586 = vmatmul.mubr.bf16.vlgmr.msra.gmra.mrb[4].mxu0 %v282_v20  ;;  %626 = vmatmul.mubr.bf16.vlgmr.msra.gmra.mrb[4].mxu1 %v284_v17 }
 0x1eb   :  { %v712_v21 = vpop.f32.mrb[4].mxu0  ;;  %v734_v22 = vpop.f32.mrb[4].mxu1 }
 0x1ec   :  { %v713_v24 = vpop.f32.mrb[5].mxu0  ;;  %v735_v25 = vpop.f32.mrb[5].mxu1 }
 0x1ed   :  { %v714_v26 = vadd.f32 %v713_v24, %v712_v21  ;;  %v736_v27 = vadd.f32 %v735_v25, %v734_v22  ;;  %v715_v28 = vpop.f32.mrb[6].mxu0  ;;  %v737_v29 = vpop.f32.mrb[6].mxu1 }
 0x1ee   :  { %v716_v30 = vpop.f32.mrb[7].mxu0  ;;  %v738_v31 = vpop.f32.mrb[7].mxu1 }
 0x1ef   :  { %v588_v32 = vadd.f32 %v714_v26, %v662_v23 }
 0x1f1   :  { %v628_v33 = vadd.f32 %v736_v27, %v588_v32 }
 0x1f3   :  { %633 = vst [vmem:[%s936_s5] sm:$0xff] %v628_v33 }
 0x1f4   :  { %638 = vsyncpa [#allocation3], 1 }
 0x1f5   :  { %639 = vsyncpa [#allocation5], 1 }

</bundles_post_ra>
